<compile_context>
chip_gen: v7x
topology: tpu7x:2x2x1
jax: 0.10.0
libtpu: 0.0.40
codegen_flags: <defaults>
</compile_context>

<pallas_src>
import jax
import jax.numpy as jnp
from jax import lax
from jax.experimental import pallas as pl
from jax.experimental.pallas import tpu as pltpu


def _round_up(x, m):
    return (x + m - 1) // m * m


# ---------------------------------------------------------------------------
# Kernel 1: im2col matmul + fused (folded) BN bias + ReLU
# ---------------------------------------------------------------------------
def conv_bn_relu_kernel(p_ref, w_ref, b_ref, o_ref):
    # p_ref: [TILE_M, K] bf16 patches
    # w_ref: [K, Cp]     bf16 weights with BN scale folded in (VMEM-resident)
    # b_ref: [1, Cp]     f32 folded BN bias (VMEM-resident)
    # o_ref: [TILE_M, Cp] bf16 (lane-dense, Cp is a multiple of 128)
    acc = jnp.dot(p_ref[...], w_ref[...], preferred_element_type=jnp.float32)
    y = jnp.maximum(acc + b_ref[...], 0.0)
    o_ref[...] = y.astype(o_ref.dtype)


def conv_bn_relu(patches, w_folded, bias, tile_m):
    M_pad, K = patches.shape
    Cp = w_folded.shape[1]
    grid_m = M_pad // tile_m
    return pl.pallas_call(
        conv_bn_relu_kernel,
        out_shape=jax.ShapeDtypeStruct((M_pad, Cp), jnp.bfloat16),
        grid_spec=pltpu.PrefetchScalarGridSpec(
            num_scalar_prefetch=0,
            grid=(grid_m,),
            in_specs=[
                pl.BlockSpec((tile_m, K), lambda i: (i, 0)),
                pl.BlockSpec((K, Cp), lambda i: (0, 0)),   # resident across grid
                pl.BlockSpec((1, Cp), lambda i: (0, 0)),   # resident across grid
            ],
            out_specs=pl.BlockSpec((tile_m, Cp), lambda i: (i, 0)),
        ),
        compiler_params=pltpu.CompilerParams(
            dimension_semantics=("parallel",)),
    )(patches, w_folded, bias)


# ---------------------------------------------------------------------------
# Kernel 2: 3x3 / stride-2 / pad-1 max pool (direct stride-2, zero border)
# ---------------------------------------------------------------------------
def maxpool_kernel(x_ref, o_ref, xp_ref):
    # x_ref : [1, H1, W1, C]  (bf16, post-ReLU so all values >= 0)
    # o_ref : [1, Ho, Wo, C]  (f32)
    # xp_ref: [2*Ho+2, 2*Wo+2, C] VMEM scratch, zero-padded border
    H1, W1 = x_ref.shape[1], x_ref.shape[2]
    Ho, Wo, C = o_ref.shape[1], o_ref.shape[2], o_ref.shape[3]
    W2 = 2 * Wo

    # Zero border (0 is a valid pad value post-ReLU, so -inf is unnecessary),
    # then drop the input block into the interior.
    xp_ref[...] = jnp.zeros_like(xp_ref)
    xp_ref[1:H1 + 1, 1:W1 + 1, :] = x_ref[0]
    xp = xp_ref[...]

    # 3-tap max along W (stride-1, cheap VPU work on a W2-wide slab).
    c3 = jnp.maximum(jnp.maximum(xp[:, 0:W2, :], xp[:, 1:W2 + 1, :]),
                     xp[:, 2:W2 + 2, :])                       # [2Ho+2, W2, C]

    # 3-tap max along H directly at stride 2: contiguous slice + major-dim
    # reshape/select (no strided slicing, no full stride-1 map).
    def rows(dh):
        return c3[dh:dh + 2 * Ho].reshape(Ho, 2, W2, C)[:, 0]  # rows dh+2i

    r = jnp.maximum(jnp.maximum(rows(0), rows(1)), rows(2))    # [Ho, W2, C]

    # Subsample even columns -> stride-2 along W.
    r = r.reshape(Ho, Wo, 2, C)[:, :, 0, :]                    # [Ho, Wo, C]
    o_ref[...] = r[None].astype(o_ref.dtype)


def maxpool_3x3_s2_p1(y_nhwc):
    N, H1, W1, C = y_nhwc.shape
    Ho = (H1 - 1) // 2 + 1
    Wo = (W1 - 1) // 2 + 1
    return pl.pallas_call(
        maxpool_kernel,
        out_shape=jax.ShapeDtypeStruct((N, Ho, Wo, C), jnp.float32),
        grid_spec=pltpu.PrefetchScalarGridSpec(
            num_scalar_prefetch=0,
            grid=(N,),
            in_specs=[pl.BlockSpec((1, H1, W1, C), lambda n: (n, 0, 0, 0))],
            out_specs=pl.BlockSpec((1, Ho, Wo, C), lambda n: (n, 0, 0, 0)),
            scratch_shapes=[
                pltpu.VMEM((2 * Ho + 2, 2 * Wo + 2, C), y_nhwc.dtype)],
        ),
        compiler_params=pltpu.CompilerParams(
            dimension_semantics=("parallel",)),
    )(y_nhwc)


# ---------------------------------------------------------------------------
# BasicStem forward
# ---------------------------------------------------------------------------
def basic_stem_forward(x_nchw, w_conv, bn_gamma, bn_beta, bn_mean, bn_var,
                       eps=1e-5, tile_m=1024):
    """x_nchw: [N, Cin, H, W]; w_conv: [Cout, Cin, 7, 7] (PyTorch layout)."""
    N, Cin, H, W = x_nchw.shape
    Cout = w_conv.shape[0]
    k, stride, pad = 7, 2, 3
    H1 = (H + 2 * pad - k) // stride + 1
    W1 = (W + 2 * pad - k) // stride + 1
    Cp = _round_up(Cout, 128)          # lane-dense output channel count

    # Fold inference-mode BN into the weights (scale) and a bias vector.
    # TODO(synk): PyTorch BN in train() mode uses batch statistics; this is
    # inference (running-stats) semantics.
    inv_std = 1.0 / jnp.sqrt(bn_var + eps)
    scale = bn_gamma * inv_std                           # [Cout]
    bias = bn_beta - bn_mean * scale                     # [Cout]

    # Weight [Cout,Cin,kh,kw] -> [K, Cout], scale folded, bf16, pad Cout->Cp.
    w2d = jnp.transpose(w_conv, (2, 3, 1, 0)).reshape(k * k * Cin, Cout)
    w_folded = (w2d * scale[None, :]).astype(jnp.bfloat16)
    w_folded = jnp.pad(w_folded, ((0, 0), (0, Cp - Cout)))
    bias_p = jnp.pad(bias, (0, Cp - Cout)).reshape(1, Cp).astype(jnp.float32)

    # im2col in bf16 (halves the dominant HBM read traffic vs f32).
    # TODO(synk): build the [TILE_M, K] patch tile in-kernel from a halo'd
    # input stripe (memory_space=pl.ANY + manual DMA) to remove the remaining
    # im2col read inflation and the HBM write/read of `patches`.
    x_nhwc = jnp.transpose(x_nchw, (0, 2, 3, 1)).astype(jnp.bfloat16)
    x_p = jnp.pad(x_nhwc, ((0, 0), (pad, pad), (pad, pad), (0, 0)))
    cols = []
    for kh in range(k):
        for kw in range(k):
            cols.append(x_p[:, kh:kh + stride * H1:stride,
                              kw:kw + stride * W1:stride, :])   # [N,H1,W1,Cin]
    patches = jnp.stack(cols, axis=3).reshape(N * H1 * W1, k * k * Cin)

    # M-tiling (round M up to a multiple of the tile; pad rows are sliced off).
    M = N * H1 * W1
    tm = min(tile_m, _round_up(M, 8))
    M_pad = _round_up(M, tm)
    if M_pad != M:
        patches = jnp.pad(patches, ((0, M_pad - M), (0, 0)))

    # --- Pallas: conv-as-matmul + folded BN + ReLU (bf16 out, Cp lanes) ---
    y = conv_bn_relu(patches, w_folded, bias_p, tm)     # [M_pad, Cp] bf16
    y = y[:M].reshape(N, H1, W1, Cp)                    # NHWC, stays bf16

    # --- Pallas: max pool (direct stride-2) ---
    z = maxpool_3x3_s2_p1(y)                            # [N, Ho, Wo, Cp] f32
    z = z[..., :Cout]                                   # drop channel pad
    return jnp.transpose(z, (0, 3, 1, 2))               # back to NCHW


# ---------------------------------------------------------------------------
# Pure-JAX reference (silent correctness check)
# ---------------------------------------------------------------------------
def reference_forward(x, w, g, b, m, v, eps=1e-5):
    y = lax.conv_general_dilated(
        x, w, window_strides=(2, 2), padding=((3, 3), (3, 3)),
        dimension_numbers=("NCHW", "OIHW", "NCHW"),
        precision=lax.Precision.HIGHEST)
    inv_std = 1.0 / jnp.sqrt(v + eps)
    y = y * (g * inv_std)[None, :, None, None] + \
        (b - m * g * inv_std)[None, :, None, None]
    y = jnp.maximum(y, 0.0)
    y = lax.reduce_window(
        y, -jnp.inf, lax.max, window_dimensions=(1, 1, 3, 3),
        window_strides=(1, 1, 2, 2),
        padding=((0, 0), (0, 0), (1, 1), (1, 1)))
    return y


if __name__ == "__main__":
    key = jax.random.PRNGKey(0)
    k_x, k_w, k_g, k_b, k_m, k_v = jax.random.split(key, 6)

    N, Cin, H, W = 2, 3, 16, 16
    Cout = 64

    x = jax.random.normal(k_x, (N, Cin, H, W), dtype=jnp.float32)

    # c2_msra_fill ~ kaiming_normal(mode="fan_out"): std = sqrt(2 / (Cout*7*7))
    fan_out = Cout * 7 * 7
    w_conv = jax.random.normal(k_w, (Cout, Cin, 7, 7), jnp.float32) * \
        jnp.sqrt(2.0 / fan_out)

    bn_gamma = 1.0 + 0.1 * jax.random.normal(k_g, (Cout,), jnp.float32)
    bn_beta = 0.1 * jax.random.normal(k_b, (Cout,), jnp.float32)
    bn_mean = 0.05 * jax.random.normal(k_m, (Cout,), jnp.float32)
    bn_var = 1.0 + 0.1 * jnp.abs(jax.random.normal(k_v, (Cout,), jnp.float32))

    stem = jax.jit(basic_stem_forward)
    out = stem(x, w_conv, bn_gamma, bn_beta, bn_mean, bn_var)
    out = jax.block_until_ready(out)

    ref = reference_forward(x, w_conv, bn_gamma, bn_beta, bn_mean, bn_var)
    assert out.shape == (N, Cout, 4, 4), out.shape
    # bf16 MXU inputs / bf16 intermediate -> loose-ish tolerance vs f32 ref.
    err = float(jnp.max(jnp.abs(out - ref)))
    assert err < 5e-2, err

    print("KERNEL_OK")
</pallas_src>

<mosaic_0001>
module attributes {stable_mosaic.version = 11 : i64} {
  func.func @conv_bn_relu_kernel(%arg0: i32, %arg1: memref<128x147xbf16, #tpu.memory_space<vmem>>, %arg2: memref<147x128xbf16, #tpu.memory_space<vmem>>, %arg3: memref<1x128xf32, #tpu.memory_space<vmem>>, %arg4: memref<128x128xbf16, #tpu.memory_space<vmem>>) attributes {dimension_semantics = [#tpu.dimension_semantics<parallel>], iteration_bounds = array<i64: 1>, scalar_prefetch = 0 : i64, scratch_operands = 0 : i64, tpu.core_type = #tpu.core_type<tc>, window_params = [{transform_indices = @transform_0, window_bounds = array<i64: 128, 147>}, {pipeline_mode = #tpu.pipeline_mode<synchronous>, transform_indices = @transform_1, window_bounds = array<i64: 147, 128>}, {pipeline_mode = #tpu.pipeline_mode<synchronous>, transform_indices = @transform_2, window_bounds = array<i64: 1, 128>}, {transform_indices = @transform_3, window_bounds = array<i64: 128, 128>}]} {
    %c0 = arith.constant 0 : index
    %c0_0 = arith.constant 0 : index
    %0 = vector.load %arg1[%c0, %c0_0] : memref<128x147xbf16, #tpu.memory_space<vmem>>, vector<128x147xbf16>
    %c0_1 = arith.constant 0 : index
    %c0_2 = arith.constant 0 : index
    %1 = vector.load %arg2[%c0_1, %c0_2] : memref<147x128xbf16, #tpu.memory_space<vmem>>, vector<147x128xbf16>
    %cst = arith.constant dense<0.000000e+00> : vector<128x128xf32>
    %2 = tpu.matmul %0, %1, %cst {dimension_numbers = #tpu.dot_dimension_numbers<[1], [0], [0], [1], [0, 0, 1, 1], [], []>} : vector<128x147xbf16>, vector<147x128xbf16>, vector<128x128xf32> -> vector<128x128xf32>
    %c0_3 = arith.constant 0 : index
    %c0_4 = arith.constant 0 : index
    %3 = vector.load %arg3[%c0_3, %c0_4] : memref<1x128xf32, #tpu.memory_space<vmem>>, vector<1x128xf32>
    %4 = vector.broadcast %3 : vector<1x128xf32> to vector<128x128xf32>
    %5 = arith.addf %2, %4 : vector<128x128xf32>
    %cst_5 = arith.constant 0.000000e+00 : f32
    %6 = vector.broadcast %cst_5 : f32 to vector<128x128xf32>
    %7 = arith.maximumf %5, %6 : vector<128x128xf32>
    %8 = arith.truncf %7 : vector<128x128xf32> to vector<128x128xbf16>
    %c0_6 = arith.constant 0 : index
    %c0_7 = arith.constant 0 : index
    %9 = vector.load %arg4[%c0_6, %c0_7] : memref<128x128xbf16, #tpu.memory_space<vmem>>, vector<128x128xbf16>
    tpu.vector_store %arg4[%c0_6, %c0_7], %8 {strides = array<i32>} : memref<128x128xbf16, #tpu.memory_space<vmem>>, vector<128x128xbf16>,
    return
  }
  func.func @transform_0(%arg0: i32) -> (i32, i32) {
    %c0_i32 = arith.constant 0 : i32
    %c0_i32_0 = arith.constant 0 : i32
    return %arg0, %c0_i32 : i32, i32
  }
  func.func @transform_1(%arg0: i32) -> (i32, i32) {
    %c0_i32 = arith.constant 0 : i32
    %c0_i32_0 = arith.constant 0 : i32
    %c0_i32_1 = arith.constant 0 : i32
    return %c0_i32, %c0_i32_0 : i32, i32
  }
  func.func @transform_2(%arg0: i32) -> (i32, i32) {
    %c0_i32 = arith.constant 0 : i32
    %c0_i32_0 = arith.constant 0 : i32
    %c0_i32_1 = arith.constant 0 : i32
    return %c0_i32, %c0_i32_0 : i32, i32
  }
  func.func @transform_3(%arg0: i32) -> (i32, i32) {
    %c0_i32 = arith.constant 0 : i32
    %c0_i32_0 = arith.constant 0 : i32
    return %arg0, %c0_i32 : i32, i32
  }
}

module attributes {stable_mosaic.version = 11 : i64} {
  func.func @maxpool_kernel(%arg0: i32, %arg1: memref<1x8x8x128xbf16, #tpu.memory_space<vmem>>, %arg2: memref<1x4x4x128xf32, #tpu.memory_space<vmem>>, %arg3: memref<10x10x128xbf16, #tpu.memory_space<vmem>>) attributes {dimension_semantics = [#tpu.dimension_semantics<parallel>], iteration_bounds = array<i64: 2>, scalar_prefetch = 0 : i64, scratch_operands = 1 : i64, tpu.core_type = #tpu.core_type<tc>, window_params = [{transform_indices = @transform_0, window_bounds = array<i64: 1, 8, 8, 128>}, {transform_indices = @transform_1, window_bounds = array<i64: 1, 4, 4, 128>}]} {
    %cst = arith.constant 0.000000e+00 : bf16
    %0 = vector.broadcast %cst : bf16 to vector<10x10x128xbf16>
    %c0 = arith.constant 0 : index
    %c0_0 = arith.constant 0 : index
    %c0_1 = arith.constant 0 : index
    %1 = vector.load %arg3[%c0, %c0_0, %c0_1] : memref<10x10x128xbf16, #tpu.memory_space<vmem>>, vector<10x10x128xbf16>
    tpu.vector_store %arg3[%c0, %c0_0, %c0_1], %0 {strides = array<i32>} : memref<10x10x128xbf16, #tpu.memory_space<vmem>>, vector<10x10x128xbf16>,
    %c0_2 = arith.constant 0 : index
    %c0_3 = arith.constant 0 : index
    %c0_4 = arith.constant 0 : index
    %c0_5 = arith.constant 0 : index
    %2 = vector.load %arg1[%c0_2, %c0_3, %c0_4, %c0_5] : memref<1x8x8x128xbf16, #tpu.memory_space<vmem>>, vector<1x8x8x128xbf16>
    %3 = vector.shape_cast %2 : vector<1x8x8x128xbf16> to vector<8x8x128xbf16>
    %c1 = arith.constant 1 : index
    %c1_6 = arith.constant 1 : index
    %c0_7 = arith.constant 0 : index
    %4 = vector.load %arg3[%c1, %c1_6, %c0_7] : memref<10x10x128xbf16, #tpu.memory_space<vmem>>, vector<8x8x128xbf16>
    tpu.vector_store %arg3[%c1, %c1_6, %c0_7], %3 {strides = array<i32>} : memref<10x10x128xbf16, #tpu.memory_space<vmem>>, vector<8x8x128xbf16>,
    %c0_8 = arith.constant 0 : index
    %c0_9 = arith.constant 0 : index
    %c0_10 = arith.constant 0 : index
    %5 = vector.load %arg3[%c0_8, %c0_9, %c0_10] : memref<10x10x128xbf16, #tpu.memory_space<vmem>>, vector<10x10x128xbf16>
    %6 = vector.extract_strided_slice %5 {offsets = [0, 0, 0], sizes = [10, 8, 128], strides = [1, 1, 1]} : vector<10x10x128xbf16> to vector<10x8x128xbf16>
    %7 = vector.extract_strided_slice %5 {offsets = [0, 1, 0], sizes = [10, 8, 128], strides = [1, 1, 1]} : vector<10x10x128xbf16> to vector<10x8x128xbf16>
    %8 = arith.maximumf %6, %7 : vector<10x8x128xbf16>
    %9 = vector.extract_strided_slice %5 {offsets = [0, 2, 0], sizes = [10, 8, 128], strides = [1, 1, 1]} : vector<10x10x128xbf16> to vector<10x8x128xbf16>
    %10 = arith.maximumf %8, %9 : vector<10x8x128xbf16>
    %11 = vector.extract_strided_slice %10 {offsets = [0, 0, 0], sizes = [8, 8, 128], strides = [1, 1, 1]} : vector<10x8x128xbf16> to vector<8x8x128xbf16>
    %12 = vector.shape_cast %11 : vector<8x8x128xbf16> to vector<4x2x8x128xbf16>
    %13 = vector.extract_strided_slice %12 {offsets = [0, 0, 0, 0], sizes = [4, 1, 8, 128], strides = [1, 1, 1, 1]} : vector<4x2x8x128xbf16> to vector<4x1x8x128xbf16>
    %14 = vector.shape_cast %13 : vector<4x1x8x128xbf16> to vector<4x8x128xbf16>
    %15 = vector.extract_strided_slice %10 {offsets = [1, 0, 0], sizes = [8, 8, 128], strides = [1, 1, 1]} : vector<10x8x128xbf16> to vector<8x8x128xbf16>
    %16 = vector.shape_cast %15 : vector<8x8x128xbf16> to vector<4x2x8x128xbf16>
    %17 = vector.extract_strided_slice %16 {offsets = [0, 0, 0, 0], sizes = [4, 1, 8, 128], strides = [1, 1, 1, 1]} : vector<4x2x8x128xbf16> to vector<4x1x8x128xbf16>
    %18 = vector.shape_cast %17 : vector<4x1x8x128xbf16> to vector<4x8x128xbf16>
    %19 = arith.maximumf %14, %18 : vector<4x8x128xbf16>
    %20 = vector.extract_strided_slice %10 {offsets = [2, 0, 0], sizes = [8, 8, 128], strides = [1, 1, 1]} : vector<10x8x128xbf16> to vector<8x8x128xbf16>
    %21 = vector.shape_cast %20 : vector<8x8x128xbf16> to vector<4x2x8x128xbf16>
    %22 = vector.extract_strided_slice %21 {offsets = [0, 0, 0, 0], sizes = [4, 1, 8, 128], strides = [1, 1, 1, 1]} : vector<4x2x8x128xbf16> to vector<4x1x8x128xbf16>
    %23 = vector.shape_cast %22 : vector<4x1x8x128xbf16> to vector<4x8x128xbf16>
    %24 = arith.maximumf %19, %23 : vector<4x8x128xbf16>
    %25 = vector.shape_cast %24 : vector<4x8x128xbf16> to vector<4x4x2x128xbf16>
    %26 = vector.extract_strided_slice %25 {offsets = [0, 0, 0, 0], sizes = [4, 4, 1, 128], strides = [1, 1, 1, 1]} : vector<4x4x2x128xbf16> to vector<4x4x1x128xbf16>
    %27 = vector.shape_cast %26 : vector<4x4x1x128xbf16> to vector<4x4x128xbf16>
    %28 = vector.shape_cast %27 : vector<4x4x128xbf16> to vector<1x4x4x128xbf16>
    %29 = arith.extf %28 : vector<1x4x4x128xbf16> to vector<1x4x4x128xf32>
    %c0_11 = arith.constant 0 : index
    %c0_12 = arith.constant 0 : index
    %c0_13 = arith.constant 0 : index
    %c0_14 = arith.constant 0 : index
    %30 = vector.load %arg2[%c0_11, %c0_12, %c0_13, %c0_14] : memref<1x4x4x128xf32, #tpu.memory_space<vmem>>, vector<1x4x4x128xf32>
    tpu.vector_store %arg2[%c0_11, %c0_12, %c0_13, %c0_14], %29 {strides = array<i32>} : memref<1x4x4x128xf32, #tpu.memory_space<vmem>>, vector<1x4x4x128xf32>,
    return
  }
  func.func @transform_0(%arg0: i32) -> (i32, i32, i32, i32) {
    %c0_i32 = arith.constant 0 : i32
    %c0_i32_0 = arith.constant 0 : i32
    %c0_i32_1 = arith.constant 0 : i32
    %c0_i32_2 = arith.constant 0 : i32
    return %arg0, %c0_i32, %c0_i32_0, %c0_i32_1 : i32, i32, i32, i32
  }
  func.func @transform_1(%arg0: i32) -> (i32, i32, i32, i32) {
    %c0_i32 = arith.constant 0 : i32
    %c0_i32_0 = arith.constant 0 : i32
    %c0_i32_1 = arith.constant 0 : i32
    %c0_i32_2 = arith.constant 0 : i32
    return %arg0, %c0_i32, %c0_i32_0, %c0_i32_1 : i32, i32, i32, i32
  }
}

</mosaic_0001>

<bundles_post_ra>
// kernel: basic_stem_forward.2
= control target key start
LH: loop header
LB: loop body
LE: loop exit
PB: predicated region body
PF: predicated region fallthrough
CT: control target
= control target key end

     0   :  { %v585_v0 = vmov 0   ;;  %vm186_vm0 = vcmask 154624   ;;  %vm211_vm1 = vcmask 1040384   ;;  %vm212_vm2 = vcmask 1041408   ;;  %s738_s1 = inlined_call_operand.vmem [shape: bf16[147,128], index: 1, kind: input, shape index: {}]   ;;  %s739_s0 = inlined_call_operand.vmem [shape: bf16[128,147], index: 0, kind: input, shape index: {}]   ;;  %s740_s2 = inlined_call_operand.vmem [shape: f32[1,128], index: 2, kind: input, shape index: {}]   ;;  %s741_s3 = inlined_call_operand.vmem [shape: bf16[128,128], index: 3, kind: output, shape index: {}]  }
   0x1   :  { %218 = vmatprep.subr.bf16.mxu0 %v585_v0  ;;  %529 = vmatprep.subr.bf16.mxu1 %v585_v0  ;;  %v551_v1 = vld [vmem:[%s738_s1] sm:$0xff]   ;;  %v552_v2 = vld [vmem:[%s738_s1 + $0x8] sm:$0xff]   ;;  %v553_v3 = vld [vmem:[%s738_s1 + $0x10] sm:$0xff]   ;;  %v586_v11 = vmov 65535  }
   0x2   :  { %219 = vmatpush1.bf16.msra.mxu0 %v551_v1  ;;  %539 = vmatpush1.bf16.msra.mxu1 %v551_v1  ;;  %v554_v4 = vld [vmem:[%s738_s1 + $0x18] sm:$0xff]   ;;  %v563_v5 = vld [vmem:[%s739_s0 + $0x4] ss:$8 sps:$4 sm:$0xff]   ;;  %v557_v9 = vld [vmem:[%s738_s1 + $0x30] sm:$0xff]   ;;  %v213_v12 = vsel %vm211_vm1, 4294967295, %v586_v11 }
   0x3   :  { %220 = vmatprep.subr.bf16.mxu0 %v585_v0  ;;  %530 = vmatprep.subr.bf16.mxu1 %v585_v0  ;;  %v566_v6 = vld [vmem:[%s739_s0 + $0x44] ss:$8 sps:$4 sm:$0xff]   ;;  %v558_v10 = vld [vmem:[%s738_s1 + $0x38] sm:$0xff]   ;;  %v560_v14 = vld [vmem:[%s738_s1 + $0x48] ss:$0 sps:$4 sm:$0x33]  }
   0x4   :  { %442 = vmatprep.mubr.msk.bf16.mxu0 %vm186_vm0, %v563_v5  ;;  %v555_v7 = vld [vmem:[%s738_s1 + $0x20] sm:$0xff]   ;;  %446 = vmatprep.mubr.msk.bf16.mxu1 %vm186_vm0, %v566_v6  ;;  %v556_v8 = vld [vmem:[%s738_s1 + $0x28] sm:$0xff]   ;;  %v214_v15 = vsel %vm212_vm2, %v213_v12, 0  ;;  %v567_v19 = vld [vmem:[%s739_s0 + $0x14] ss:$8 sps:$4 sm:$0xff]  }
   0x5   :  { %v559_v13 = vld [vmem:[%s738_s1 + $0x40] sm:$0xff]   ;;  %v216_v16 = vand.u32 %v560_v14, %v214_v15  ;;  %v569_v20 = vld [vmem:[%s739_s0 + $0x54] ss:$8 sps:$4 sm:$0xff]   ;;  %v571_v21 = vld [vmem:[%s739_s0 + $0x10] ss:$8 sps:$4 sm:$0xff]  }
   0x6   :  { %221 = vmatpush1.bf16.msra.mxu0 %v552_v2  ;;  %540 = vmatpush1.bf16.msra.mxu1 %v552_v2  ;;  %v561_v17 = vld [vmem:[%s739_s0] ss:$8 sps:$4 sm:$0xff]   ;;  %v572_v22 = vld [vmem:[%s739_s0 + $0x50] ss:$8 sps:$4 sm:$0xff]   ;;  %v573_v23 = vld [vmem:[%s739_s0 + $0x24] ss:$8 sps:$4 sm:$0xff]  }
   0x7   :  { %222 = vmatprep.subr.bf16.mxu0 %v585_v0  ;;  %531 = vmatprep.subr.bf16.mxu1 %v585_v0  ;;  %v564_v18 = vld [vmem:[%s739_s0 + $0x40] ss:$8 sps:$4 sm:$0xff]   ;;  %v575_v24 = vld [vmem:[%s739_s0 + $0x64] ss:$8 sps:$4 sm:$0xff]   ;;  %v579_v27 = vld [vmem:[%s739_s0 + $0x34] ss:$8 sps:$4 sm:$0xff]  }
   0x8   :  { %v577_v25 = vld [vmem:[%s739_s0 + $0x20] ss:$8 sps:$4 sm:$0xff]   ;;  %v581_v28 = vld [vmem:[%s739_s0 + $0x74] ss:$8 sps:$4 sm:$0xff]   ;;  %v583_v29 = vld [vmem:[%s739_s0 + $0x30] ss:$8 sps:$4 sm:$0xff]  }
   0x9   :  { %v578_v26 = vld [vmem:[%s739_s0 + $0x60] ss:$8 sps:$4 sm:$0xff]   ;;  %v584_v30 = vld [vmem:[%s739_s0 + $0x70] ss:$8 sps:$4 sm:$0xff]  }
   0xa   :  { %223 = vmatpush1.bf16.msra.mxu0 %v553_v3  ;;  %541 = vmatpush1.bf16.msra.mxu1 %v553_v3  ;;  %v696_v31 = vld [vmem:[%s740_s2] ss:$0 sm:$0xff] }
   0xb   :  { %224 = vmatprep.subr.bf16.mxu0 %v585_v0  ;;  %532 = vmatprep.subr.bf16.mxu1 %v585_v0 }
   0xe   :  { %225 = vmatpush1.bf16.msra.mxu0 %v554_v4  ;;  %542 = vmatpush1.bf16.msra.mxu1 %v554_v4 }
   0xf   :  { %226 = vmatprep.subr.bf16.mxu0 %v585_v0  ;;  %533 = vmatprep.subr.bf16.mxu1 %v585_v0 }
  0x12   :  { %227 = vmatpush1.bf16.msra.mxu0 %v555_v7  ;;  %543 = vmatpush1.bf16.msra.mxu1 %v555_v7 }
  0x13   :  { %228 = vmatprep.subr.bf16.mxu0 %v585_v0  ;;  %534 = vmatprep.subr.bf16.mxu1 %v585_v0 }
  0x16   :  { %229 = vmatpush1.bf16.msra.mxu0 %v556_v8  ;;  %544 = vmatpush1.bf16.msra.mxu1 %v556_v8 }
  0x17   :  { %230 = vmatprep.subr.bf16.mxu0 %v585_v0  ;;  %535 = vmatprep.subr.bf16.mxu1 %v585_v0 }
  0x1a   :  { %231 = vmatpush1.bf16.msra.mxu0 %v557_v9  ;;  %545 = vmatpush1.bf16.msra.mxu1 %v557_v9 }
  0x1b   :  { %232 = vmatprep.subr.bf16.mxu0 %v585_v0  ;;  %536 = vmatprep.subr.bf16.mxu1 %v585_v0 }
  0x1e   :  { %233 = vmatpush1.bf16.msra.mxu0 %v558_v10  ;;  %546 = vmatpush1.bf16.msra.mxu1 %v558_v10 }
  0x1f   :  { %234 = vmatprep.subr.bf16.mxu0 %v585_v0  ;;  %537 = vmatprep.subr.bf16.mxu1 %v585_v0 }
  0x22   :  { %235 = vmatpush1.bf16.msra.mxu0 %v559_v13  ;;  %547 = vmatpush1.bf16.msra.mxu1 %v559_v13 }
  0x23   :  { %236 = vmatprep.subr.bf16.mxu0 %v585_v0  ;;  %538 = vmatprep.subr.bf16.mxu1 %v585_v0 }
  0x26   :  { %237 = vmatpush1.bf16.msra.mxu0 %v216_v16  ;;  %548 = vmatpush1.bf16.msra.mxu1 %v216_v16 }
  0x29   :  { %251 = vmatmul.mubr.bf16.vlgmr.msra.gmra.mrb[0].mxu0 %v561_v17  ;;  %283 = vmatmul.mubr.bf16.vlgmr.msra.gmra.mrb[0].mxu1 %v564_v18 }
  0x2a   :  { %443 = vmatprep.mubr.msk.bf16.mxu0 %vm186_vm0, %v567_v19  ;;  %447 = vmatprep.mubr.msk.bf16.mxu1 %vm186_vm0, %v569_v20 }
  0x31   :  { %259 = vmatmul.mubr.bf16.gmra.mrb[4].mxu0 %v571_v21  ;;  %291 = vmatmul.mubr.bf16.gmra.mrb[4].mxu1 %v572_v22 }
  0x32   :  { %444 = vmatprep.mubr.msk.bf16.mxu0 %vm186_vm0, %v573_v23  ;;  %448 = vmatprep.mubr.msk.bf16.mxu1 %vm186_vm0, %v575_v24 }
  0x39   :  { %267 = vmatmul.mubr.bf16.gmra.mrb[8].mxu0 %v577_v25  ;;  %299 = vmatmul.mubr.bf16.gmra.mrb[8].mxu1 %v578_v26 }
  0x3a   :  { %445 = vmatprep.mubr.msk.bf16.mxu0 %vm186_vm0, %v579_v27  ;;  %449 = vmatprep.mubr.msk.bf16.mxu1 %vm186_vm0, %v581_v28 }
  0x41   :  { %275 = vmatmul.mubr.bf16.gmra.mrb[12].mxu0 %v583_v29  ;;  %307 = vmatmul.mubr.bf16.gmra.mrb[12].mxu1 %v584_v30 }
  0xfc   :  { %v252_v32 = vpop.f32.mrb[0].mxu0  ;;  %v284_v33 = vpop.f32.mrb[0].mxu1 }
  0xfd   :  { %v253_v34 = vadd.f32 %v696_v31, %v252_v32  ;;  %v285_v35 = vadd.f32 %v696_v31, %v284_v33  ;;  %v254_v36 = vpop.f32.mrb[1].mxu0  ;;  %v286_v37 = vpop.f32.mrb[1].mxu1 }
  0xfe   :  { %v255_v38 = vpop.f32.mrb[2].mxu0  ;;  %v287_v39 = vpop.f32.mrb[2].mxu1 }
  0xff   :  { %v256_v40 = vadd.f32 %v696_v31, %v255_v38  ;;  %v288_v41 = vadd.f32 %v696_v31, %v287_v39  ;;  %v257_v42 = vpop.f32.mrb[3].mxu0  ;;  %v289_v43 = vpop.f32.mrb[3].mxu1  ;;  %v315_v44 = vmax.f32 %v253_v34, 0.0  ;;  %v323_v45 = vmax.f32 %v285_v35, 0.0 }
 0x101   :  { %v316_v46 = vmax.f32 %v256_v40, 0.0  ;;  %v324_v47 = vmax.f32 %v288_v41, 0.0 }
 0x103   :  { %v485_v48 = vpack.c.bf16 %v316_v46, %v315_v44  ;;  %v505_v49 = vpack.c.bf16 %v324_v47, %v323_v45 }
 0x104   :  { %v260_v50 = vpop.f32.mrb[4].mxu0  ;;  %v292_v51 = vpop.f32.mrb[4].mxu1 }
 0x105   :  { %486 = vst [vmem:[%s741_s3] sm:$0xff] %v485_v48   ;;  %525 = vst [vmem:[%s741_s3 + $0x20] sm:$0xff] %v505_v49   ;;  %v261_v52 = vadd.f32 %v696_v31, %v260_v50  ;;  %v293_v53 = vadd.f32 %v696_v31, %v292_v51  ;;  %v262_v54 = vpop.f32.mrb[5].mxu0  ;;  %v294_v55 = vpop.f32.mrb[5].mxu1 }
 0x106   :  { %v263_v56 = vpop.f32.mrb[6].mxu0  ;;  %v295_v57 = vpop.f32.mrb[6].mxu1 }
 0x107   :  { %v264_v58 = vadd.f32 %v696_v31, %v263_v56  ;;  %v296_v59 = vadd.f32 %v696_v31, %v295_v57  ;;  %v265_v60 = vpop.f32.mrb[7].mxu0  ;;  %v297_v61 = vpop.f32.mrb[7].mxu1  ;;  %v317_v62 = vmax.f32 %v261_v52, 0.0  ;;  %v325_v63 = vmax.f32 %v293_v53, 0.0 }
 0x109   :  { %v318_v0 = vmax.f32 %v264_v58, 0.0  ;;  %v326_v1 = vmax.f32 %v296_v59, 0.0 }
 0x10b   :  { %v490_v2 = vpack.c.bf16 %v318_v0, %v317_v62  ;;  %v510_v3 = vpack.c.bf16 %v326_v1, %v325_v63 }
 0x10c   :  { %v268_v4 = vpop.f32.mrb[8].mxu0  ;;  %v300_v5 = vpop.f32.mrb[8].mxu1 }
 0x10d   :  { %522 = vst [vmem:[%s741_s3 + $0x8] sm:$0xff] %v490_v2   ;;  %526 = vst [vmem:[%s741_s3 + $0x28] sm:$0xff] %v510_v3   ;;  %v269_v6 = vadd.f32 %v696_v31, %v268_v4  ;;  %v301_v7 = vadd.f32 %v696_v31, %v300_v5  ;;  %v270_v8 = vpop.f32.mrb[9].mxu0  ;;  %v302_v9 = vpop.f32.mrb[9].mxu1 }
 0x10e   :  { %v271_v10 = vpop.f32.mrb[10].mxu0  ;;  %v303_v11 = vpop.f32.mrb[10].mxu1 }
 0x10f   :  { %v272_v12 = vadd.f32 %v696_v31, %v271_v10  ;;  %v304_v13 = vadd.f32 %v696_v31, %v303_v11  ;;  %v273_v14 = vpop.f32.mrb[11].mxu0  ;;  %v305_v15 = vpop.f32.mrb[11].mxu1  ;;  %v319_v16 = vmax.f32 %v269_v6, 0.0  ;;  %v327_v17 = vmax.f32 %v301_v7, 0.0 }
 0x111   :  { %v320_v18 = vmax.f32 %v272_v12, 0.0  ;;  %v328_v19 = vmax.f32 %v304_v13, 0.0 }
 0x113   :  { %v495_v20 = vpack.c.bf16 %v320_v18, %v319_v16  ;;  %v515_v21 = vpack.c.bf16 %v328_v19, %v327_v17 }
 0x114   :  { %v276_v22 = vpop.f32.mrb[12].mxu0  ;;  %v308_v23 = vpop.f32.mrb[12].mxu1 }
 0x115   :  { %523 = vst [vmem:[%s741_s3 + $0x10] sm:$0xff] %v495_v20   ;;  %527 = vst [vmem:[%s741_s3 + $0x30] sm:$0xff] %v515_v21   ;;  %v277_v24 = vadd.f32 %v696_v31, %v276_v22  ;;  %v309_v25 = vadd.f32 %v696_v31, %v308_v23  ;;  %v278_v26 = vpop.f32.mrb[13].mxu0  ;;  %v310_v27 = vpop.f32.mrb[13].mxu1 }
 0x116   :  { %v279_v28 = vpop.f32.mrb[14].mxu0  ;;  %v311_v29 = vpop.f32.mrb[14].mxu1 }
 0x117   :  { %v280_v30 = vadd.f32 %v696_v31, %v279_v28  ;;  %v312_v32 = vadd.f32 %v696_v31, %v311_v29  ;;  %v281_v33 = vpop.f32.mrb[15].mxu0  ;;  %v313_v34 = vpop.f32.mrb[15].mxu1  ;;  %v321_v35 = vmax.f32 %v277_v24, 0.0  ;;  %v329_v36 = vmax.f32 %v309_v25, 0.0 }
 0x119   :  { %v322_v37 = vmax.f32 %v280_v30, 0.0  ;;  %v330_v38 = vmax.f32 %v312_v32, 0.0 }
 0x11b   :  { %v500_v39 = vpack.c.bf16 %v322_v37, %v321_v35  ;;  %v520_v40 = vpack.c.bf16 %v330_v38, %v329_v36 }
 0x11d   :  { %524 = vst [vmem:[%s741_s3 + $0x18] sm:$0xff] %v500_v39   ;;  %528 = vst [vmem:[%s741_s3 + $0x38] sm:$0xff] %v520_v40  }

// kernel: basic_stem_forward.3
= control target key start
LH: loop header
LB: loop body
LE: loop exit
PB: predicated region body
PF: predicated region fallthrough
CT: control target
= control target key end

     0   :  { %s871_s6 = smov 0   ;;  %s1087_s0 = inlined_call_operand.vmem [shape: bf16[2,8,8,128], index: 0, kind: input, shape index: {}]   ;;  %s1088_s1 = inlined_call_operand.vmem [shape: f32[2,4,4,128], index: 1, kind: output, shape index: {}]  }
   0x1 LB: > { %s819_s7 = sadd.s32 4294967295, %s857_s6   ;;  %p823_p0 = scmp.ge.s32.totalorder %s857_s6, 1  ;;  %s857_s6 = sphi %s871_s6, %s11_s6  }
   0x2   : > { %p87_p1 = scmp.lt.s32.totalorder %s857_s6, 3 }
   0x4   : > { %p88_p2 = pnand %p823_p0, %p87_p1 }
   0x5   : > { %p879_p3 = scmp.lt.s32.totalorder (!%p88_p2), %s819_s7, 1  ;;  %v859_v0 = vmov (!%p88_p2), 0   ;;  %vm228_vm0 = vsmask.f32 (!%p88_p2), 7938  ;;  %vm227_vm1 = vcmask (!%p88_p2), 1043456   ;;  %vm233_vm2 = vcmask (!%p88_p2), 1040384  }
   0x6   : > { %91 = sbr.rel (%p88_p2) target bundleno = 100 (0x64), region = 24  ;;  %118 = vst [vmem:[#allocation2] sm:$0xf] (!%p88_p2), %v859_v0  ;;  %119 = vst [vmem:[#allocation2 + $0x4] sm:$0x1] (!%p88_p2), %v859_v0  ;;  %v536_v4 = vlaneseq (!%p88_p2)  ;;  %vm464_vm8 = vcmask (!%p88_p2), 1042432  }
   0x7   : > { %120 = vst [vmem:[#allocation2 + $0x8] sm:$0xf] (!%p88_p2), %v859_v0  ;;  %121 = vst [vmem:[#allocation2 + $0xc] sm:$0x1] (!%p88_p2), %v859_v0  ;;  %vm234_vm3 = vsmask.f32 (!%p88_p2), 256 }
   0x8   : > { %122 = vst [vmem:[#allocation2 + $0x10] sm:$0xf] (!%p88_p2), %v859_v0  ;;  %123 = vst [vmem:[#allocation2 + $0x14] sm:$0x1] (!%p88_p2), %v859_v0  ;;  %v860_v12 = vmov (!%p88_p2), 1966171168  }
   0x9   : > { %124 = vst [vmem:[#allocation2 + $0x18] sm:$0xf] (!%p88_p2), %v859_v0  ;;  %125 = vst [vmem:[#allocation2 + $0x1c] sm:$0x1] (!%p88_p2), %v859_v0  ;;  %v897_v13 = vunpack.c.l.s4 (!%p88_p2), %v860_v12  ;;  %v537_v24 = vshrl.u32 (!%p88_p2), %v536_v4, 7  ;;  %vm465_vm9 = vcmask (!%p88_p2), 1046532  }
   0xa   : > { %126 = vst [vmem:[#allocation2 + $0x20] sm:$0xf] (!%p88_p2), %v859_v0  ;;  %127 = vst [vmem:[#allocation2 + $0x24] sm:$0x1] (!%p88_p2), %v859_v0  ;;  %vm299_vm6 = vsmask.f32 (!%p88_p2), 3328 }
   0xb   : > { %128 = vst [vmem:[#allocation2 + $0x28] sm:$0xf] (!%p88_p2), %v859_v0  ;;  %129 = vst [vmem:[#allocation2 + $0x2c] sm:$0x1] (!%p88_p2), %v859_v0  ;;  %v535_v34 = vunpack.c.0.s8 (!%p88_p2), %v897_v13  ;;  %vm300_vm7 = vsmask.f32 (!%p88_p2), 7440 }
   0xc   : > { %130 = vst [vmem:[#allocation2 + $0x30] sm:$0xf] (!%p88_p2), %v859_v0  ;;  %131 = vst [vmem:[#allocation2 + $0x34] sm:$0x1] (!%p88_p2), %v859_v0  ;;  %v932_v63 = vsub.s32 (!%p88_p2), 0, %v537_v24  ;;  %vm741_vm12 = vcmask (!%p88_p2), 1041409  }
   0xd   : > { %132 = vst [vmem:[#allocation2 + $0x38] sm:$0xf] %v859_v0  ;;  %133 = vst [vmem:[#allocation2 + $0x3c] sm:$0x1] %v859_v0  ;;  %s1099_s7 = smov (!%p879_p3, %s819_s7), 1  ;;  %v936_v4 = vsub.s32 %v535_v34, %v537_v24  ;;  %vm743_vm13 = vcmask 1042434  }
   0xe   : > { %134 = vst [vmem:[#allocation2 + $0x40] sm:$0xf] %v859_v0  ;;  %135 = vst [vmem:[#allocation2 + $0x44] sm:$0x1] %v859_v0  ;;  %s839_s9 = sshll.u32 %s1099_s7, 5  ;;  %vm745_vm14 = vcmask 1043459  }
   0xf   : > { %s891_s12 = scalar_lea.vmem %s1087_s0, %s839_s9  ;;  %v230_v10 = vld [vmem:[#allocation2 + $0x8] sm:$0xf]  ;;  %v236_v11 = vld [vmem:[#allocation2 + $0xc] sm:$0x1]  ;;  %vm901_vm4 = vmand %vm227_vm1, %vm228_vm0  ;;  %s840_s13 = sshll.u32 %s1099_s7, 4 }
  0x10   : > { %v138_v1 = vld [vmem:[%s891_s12] sm:$0xf]  ;;  %v139_v2 = vld [vmem:[%s891_s12 + $0x4] sm:$0xf]  ;;  %v140_v3 = vld [vmem:[%s891_s12 + $0x8] sm:$0xf]  ;;  %s1021_s16 = scalar_lea.vmem %s1088_s1, %s840_s13 }
  0x11   : > { %v147_v5 = vshrl.u32 %v138_v1, 16  ;;  %v150_v6 = vshll.u32 %v138_v1, 16  ;;  %v155_v7 = vshrl.u32 %v139_v2, 16  ;;  %v158_v8 = vshll.u32 %v139_v2, 16  ;;  %v141_v9 = vld [vmem:[%s891_s12 + $0xc] sm:$0xf]  ;;  %vm907_vm5 = vmand %vm233_vm2, %vm234_vm3 }
  0x12   : > { %v239_v17 = vld [vmem:[#allocation2 + $0x10] sm:$0xf]  ;;  %v163_v18 = vshrl.u32 %v140_v3, 16  ;;  %v242_v20 = vld [vmem:[#allocation2 + $0x14] sm:$0x1]  ;;  %v166_v21 = vshll.u32 %v140_v3, 16  ;;  %vm961_vm10 = vmor %vm299_vm6, %vm300_vm7 }
  0x13   : > { %v149_v14 = vrot.slane %v147_v5, 7  ;;  %v157_v16 = vrot.slane %v155_v7, 7  ;;  %v171_v22 = vshrl.u32 %v141_v9, 16  ;;  %v174_v23 = vshll.u32 %v141_v9, 16  ;;  %v245_v29 = vld [vmem:[#allocation2 + $0x18] sm:$0xf]  ;;  %vm968_vm11 = vmor %vm464_vm8, %vm465_vm9 }
  0x14   : > { %v165_v30 = vrot.slane %v163_v18, 7  ;;  %v248_v31 = vld [vmem:[#allocation2 + $0x1c] sm:$0x1]  ;;  %v142_v33 = vld [vmem:[%s891_s12 + $0x10] sm:$0xf] }
  0x15   : > { %v152_v25 = vor.u32 %v150_v6, %v149_v14  ;;  %v153_v26 = vrot.slane %v149_v14, 4  ;;  %v160_v27 = vor.u32 %v158_v8, %v157_v16  ;;  %v161_v28 = vrot.slane %v157_v16, 4  ;;  %v251_v39 = vld [vmem:[#allocation2 + $0x20] sm:$0xf]  ;;  %v254_v40 = vld [vmem:[#allocation2 + $0x24] sm:$0x1] }
  0x16   : > { %v173_v32 = vrot.slane %v171_v22, 7  ;;  %v143_v41 = vld [vmem:[%s891_s12 + $0x14] sm:$0xf]  ;;  %v168_v42 = vor.u32 %v166_v21, %v165_v30  ;;  %v169_v43 = vrot.slane %v165_v30, 4  ;;  %v144_v46 = vld [vmem:[%s891_s12 + $0x18] sm:$0xf] }
  0x17   : > { %v231_v35 = vsel %vm901_vm4, %v152_v25, %v230_v10  ;;  %v237_v36 = vsel %vm907_vm5, %v153_v26, %v236_v11  ;;  %v240_v37 = vsel %vm901_vm4, %v160_v27, %v239_v17  ;;  %v243_v38 = vsel %vm907_vm5, %v161_v28, %v242_v20  ;;  %v257_v55 = vld [vmem:[#allocation2 + $0x28] sm:$0xf]  ;;  %v260_v56 = vld [vmem:[#allocation2 + $0x2c] sm:$0x1]  ;;  %v263_v57 = vld [vmem:[#allocation2 + $0x30] sm:$0xf] }
  0x18   : > { %232 = vst [vmem:[#allocation2 + $0x8] sm:$0xf] %v231_v35  ;;  %238 = vst [vmem:[#allocation2 + $0xc] sm:$0x1] %v237_v36  ;;  %v176_v44 = vor.u32 %v174_v23, %v173_v32  ;;  %v177_v45 = vrot.slane %v173_v32, 4  ;;  %v179_v47 = vshrl.u32 %v142_v33, 16  ;;  %v246_v51 = vsel %vm901_vm4, %v168_v42, %v245_v29 }
  0x19   : > { %241 = vst [vmem:[#allocation2 + $0x10] sm:$0xf] %v240_v37  ;;  %244 = vst [vmem:[#allocation2 + $0x14] sm:$0x1] %v243_v38  ;;  %v182_v48 = vshll.u32 %v142_v33, 16  ;;  %v187_v49 = vshrl.u32 %v143_v41, 16  ;;  %v249_v52 = vsel %vm907_vm5, %v169_v43, %v248_v31 }
  0x1a   : > { %v190_v50 = vshll.u32 %v143_v41, 16  ;;  %v252_v53 = vsel %vm901_vm4, %v176_v44, %v251_v39  ;;  %v255_v54 = vsel %vm907_vm5, %v177_v45, %v254_v40  ;;  %v145_v58 = vld [vmem:[%s891_s12 + $0x1c] sm:$0xf]  ;;  %247 = vst [vmem:[#allocation2 + $0x18] sm:$0xf] %v246_v51  ;;  %v181_v59 = vrot.slane %v179_v47, 7 }
  0x1b   : > { %250 = vst [vmem:[#allocation2 + $0x1c] sm:$0x1] %v249_v52  ;;  %253 = vst [vmem:[#allocation2 + $0x20] sm:$0xf] %v252_v53  ;;  %v189_v60 = vrot.slane %v187_v49, 7  ;;  %v195_v62 = vshrl.u32 %v144_v46, 16 }
  0x1c   : > { %256 = vst [vmem:[#allocation2 + $0x24] sm:$0x1] %v255_v54  ;;  %v266_v61 = vld [vmem:[#allocation2 + $0x34] sm:$0x1]  ;;  %v198_v0 = vshll.u32 %v144_v46, 16  ;;  %v203_v1 = vshrl.u32 %v145_v58, 16  ;;  %v184_v5 = vor.u32 %v182_v48, %v181_v59 }
  0x1d   : > { %v206_v2 = vshll.u32 %v145_v58, 16  ;;  %v934_v3 = vld [vmem:[#allocation2] sm:$0xf]  ;;  %v185_v6 = vrot.slane %v181_v59, 4  ;;  %v192_v7 = vor.u32 %v190_v50, %v189_v60  ;;  %v193_v8 = vrot.slane %v189_v60, 4 }
  0x1e   : > { %v269_v9 = vld [vmem:[#allocation2 + $0x38] sm:$0xf]  ;;  %v272_v10 = vld [vmem:[#allocation2 + $0x3c] sm:$0x1]  ;;  %v197_v11 = vrot.slane %v195_v62, 7  ;;  %v205_v12 = vrot.slane %v203_v1, 7  ;;  %v258_v17 = vsel %vm901_vm4, %v184_v5, %v257_v55 }
  0x1f   : > { %v282_v13 = vld [vmem:[#allocation2 + $0x4] sm:$0x1]  ;;  %v303_v14 = vshrl.u32 %v934_v3, 16  ;;  %v306_v16 = vshll.u32 %v934_v3, 16  ;;  %v261_v18 = vsel %vm907_vm5, %v185_v6, %v260_v56  ;;  %v264_v20 = vsel %vm901_vm4, %v192_v7, %v263_v57  ;;  %v275_v22 = vld [vmem:[#allocation2 + $0x40] sm:$0xf] }
  0x20   : > { %v267_v21 = vsel %vm907_vm5, %v193_v8, %v266_v61  ;;  %v278_v23 = vld [vmem:[#allocation2 + $0x44] sm:$0x1]  ;;  %v948_v24 = vld [vmem:[#allocation2 + $0x8] sm:$0xf]  ;;  %259 = vst [vmem:[#allocation2 + $0x28] sm:$0xf] %v258_v17  ;;  %v200_v25 = vor.u32 %v198_v0, %v197_v11  ;;  %v208_v27 = vor.u32 %v206_v2, %v205_v12 }
  0x21   : > { %262 = vst [vmem:[#allocation2 + $0x2c] sm:$0x1] %v261_v18  ;;  %265 = vst [vmem:[#allocation2 + $0x30] sm:$0xf] %v264_v20  ;;  %v201_v26 = vrot.slane %v197_v11, 4  ;;  %v209_v28 = vrot.slane %v205_v12, 4 }
  0x22   : > { %268 = vst [vmem:[#allocation2 + $0x34] sm:$0x1] %v267_v21  ;;  %v285_v29 = vld [vmem:[#allocation2 + $0x10] sm:$0xf]  ;;  %v305_v30 = vrot.slane %v303_v14, 4  ;;  %v308_v31 = vrot.slane %v306_v16, 5  ;;  %v270_v34 = vsel %vm901_vm4, %v200_v25, %v269_v9  ;;  %v276_v36 = vsel %vm901_vm4, %v208_v27, %v275_v22 }
  0x23   : > { %v312_v32 = vshll.u32 %v282_v13, 16  ;;  %v317_v33 = vshrl.u32 %v948_v24, 16  ;;  %v273_v35 = vsel %vm907_vm5, %v201_v26, %v272_v10  ;;  %v279_v37 = vsel %vm907_vm5, %v209_v28, %v278_v23  ;;  %v284_v38 = vld [vmem:[#allocation2 + $0xc] sm:$0x1]  ;;  %271 = vst [vmem:[#allocation2 + $0x38] sm:$0xf] %v270_v34 }
  0x24   : > { %274 = vst [vmem:[#allocation2 + $0x3c] sm:$0x1] %v273_v35  ;;  %277 = vst [vmem:[#allocation2 + $0x40] sm:$0xf] %v276_v36  ;;  %v286_v39 = vld [vmem:[#allocation2 + $0x14] sm:$0x1]  ;;  %v309_v41 = vor.u32 %v308_v31, %v305_v30 }
  0x25   : > { %280 = vst [vmem:[#allocation2 + $0x44] sm:$0x1] %v279_v37  ;;  %v314_v42 = vrot.slane %v312_v32, 5  ;;  %v319_v43 = vrot.slane %v317_v33, 4  ;;  %v320_v15 = vshll.u32 %v948_v24, 16  ;;  %v326_v44 = vshll.u32 %v284_v38, 16 }
  0x26   : > { %v331_v19 = vshrl.u32 %v285_v29, 16  ;;  %v334_v45 = vshll.u32 %v285_v29, 16  ;;  %v340_v46 = vshll.u32 %v286_v39, 16  ;;  %v310_v48 = vrot.slane %v309_v41, 4  ;;  %v287_v56 = vld [vmem:[#allocation2 + $0x18] sm:$0xf] }
  0x27   : > { %v322_v49 = vrot.slane %v320_v15, 5  ;;  %v828_v50 = vrot.slane %v934_v3, 9  ;;  %v469_v51 = vrot.slane %v282_v13, 5  ;;  %v328_v52 = vrot.slane %v326_v44, 5  ;;  %v288_v2 = vld [vmem:[#allocation2 + $0x1c] sm:$0x1] }
  0x28   : > { %v333_v53 = vrot.slane %v331_v19, 4  ;;  %v336_v54 = vrot.slane %v334_v45, 5  ;;  %v342_v55 = vrot.slane %v340_v46, 5  ;;  %v315_v57 = vsel %vm961_vm10, %v310_v48, %v314_v42  ;;  %v289_v7 = vld [vmem:[#allocation2 + $0x20] sm:$0xf] }
  0x29   : > { %v323_v58 = vor.u32 %v322_v49, %v319_v43  ;;  %v470_v59 = vsel %vm968_vm11, %v828_v50, %v469_v51  ;;  %v829_v60 = vrot.slane %v948_v24, 9  ;;  %v437_v62 = vmax.bf16 %v315_v57, %v934_v3  ;;  %v290_v21 = vld [vmem:[#allocation2 + $0x24] sm:$0x1]  ;;  %v291_v34 = vld [vmem:[#allocation2 + $0x28] sm:$0xf] }
  0x2a   : > { %v337_v61 = vor.u32 %v336_v54, %v333_v53  ;;  %v473_v0 = vrot.slane %v284_v38, 5  ;;  %v830_v1 = vrot.slane %v285_v29, 9  ;;  %v477_v6 = vrot.slane %v286_v39, 5  ;;  %v990_v43 = vld [vmem:[#allocation2 + $0x30] sm:$0xf] }
  0x2b   : > { %v324_v5 = vrot.slane %v323_v58, 4  ;;  %v345_v8 = vshrl.u32 %v287_v56, 16  ;;  %v348_v9 = vshll.u32 %v287_v56, 16  ;;  %v512_v12 = vmax.bf16 %v470_v59, %v437_v62  ;;  %v292_v44 = vld [vmem:[#allocation2 + $0x2c] sm:$0x1] }
  0x2c   : > { %v338_v10 = vrot.slane %v337_v61, 4  ;;  %v474_v11 = vsel %vm968_vm11, %v829_v60, %v473_v0  ;;  %v354_v13 = vshll.u32 %v288_v2, 16  ;;  %v478_v3 = vsel %vm968_vm11, %v830_v1, %v477_v6  ;;  %v294_v58 = vld [vmem:[#allocation2 + $0x34] sm:$0x1] }
  0x2d   : > { %v329_v14 = vsel %vm961_vm10, %v324_v5, %v328_v52  ;;  %v347_v16 = vrot.slane %v345_v8, 4  ;;  %v350_v17 = vrot.slane %v348_v9, 5  ;;  %v359_v23 = vshrl.u32 %v289_v7, 16 }
  0x2e   : > { %v343_v18 = vsel %vm961_vm10, %v338_v10, %v342_v55  ;;  %v438_v20 = vmax.bf16 %v329_v14, %v948_v24  ;;  %v356_v22 = vrot.slane %v354_v13, 5  ;;  %v362_v27 = vshll.u32 %v289_v7, 16 }
  0x2f   : > { %v439_v25 = vmax.bf16 %v343_v18, %v285_v29  ;;  %v351_v26 = vor.u32 %v350_v17, %v347_v16  ;;  %v368_v28 = vshll.u32 %v290_v21, 16  ;;  %v361_v31 = vrot.slane %v359_v23, 4 }
  0x30   : > { %v513_v30 = vmax.bf16 %v474_v11, %v438_v20  ;;  %v831_v32 = vrot.slane %v287_v56, 9  ;;  %v481_v33 = vrot.slane %v288_v2, 5  ;;  %v364_v37 = vrot.slane %v362_v27, 5 }
  0x31   : > { %v514_v35 = vmax.bf16 %v478_v3, %v439_v25  ;;  %v352_v36 = vrot.slane %v351_v26, 4  ;;  %v370_v38 = vrot.slane %v368_v28, 5  ;;  %v832_v41 = vrot.slane %v289_v7, 9  ;;  %v1007_v25 = vld [vmem:[#allocation2 + $0x38] sm:$0xf] }
  0x32   : > { %v521_v39 = vmax.bf16 %v513_v30, %v512_v12  ;;  %v482_v24 = vsel %vm968_vm11, %v831_v32, %v481_v33  ;;  %v485_v42 = vrot.slane %v290_v21, 5  ;;  %v365_v15 = vor.u32 %v364_v37, %v361_v31 }
  0x33   : > { %v357_v29 = vsel %vm961_vm10, %v352_v36, %v356_v22  ;;  %v373_v19 = vshrl.u32 %v291_v34, 16  ;;  %v376_v45 = vshll.u32 %v291_v34, 16  ;;  %v382_v50 = vshll.u32 %v292_v44, 16 }
  0x34   : > { %v525_v46 = vmax.bf16 %v521_v39, %v514_v35  ;;  %v440_v48 = vmax.bf16 %v357_v29, %v287_v56  ;;  %v486_v49 = vsel %vm968_vm11, %v832_v41, %v485_v42  ;;  %v366_v51 = vrot.slane %v365_v15, 4 }
  0x35   : > { %v375_v52 = vrot.slane %v373_v19, 4  ;;  %v378_v53 = vrot.slane %v376_v45, 5  ;;  %v387_v54 = vshrl.u32 %v990_v43, 16  ;;  %v384_v59 = vrot.slane %v382_v50, 5  ;;  %v1030_v45 = vld [vmem:[#allocation2 + $0x40] sm:$0xf] }
  0x36   : > { %v539_v55 = vrot.slane %v525_v46, %v936_v4  ;;  %v515_v57 = vmax.bf16 %v482_v24, %v440_v48  ;;  %v390_v60 = vshll.u32 %v990_v43, 16  ;;  %v371_v56 = vsel %vm961_vm10, %v366_v51, %v370_v38 }
  0x37   : > { %v379_v61 = vor.u32 %v378_v53, %v375_v52  ;;  %v389_v62 = vrot.slane %v387_v54, 4  ;;  %v396_v0 = vshll.u32 %v294_v58, 16  ;;  %v441_v5 = vmax.bf16 %v371_v56, %v289_v7 }
  0x38   : > { %v540_v1 = vcombine.high %v539_v55, %v539_v55  ;;  %v547_v2 = vrot.slane %v539_v55, %v936_v4  ;;  %v522_v6 = vmax.bf16 %v515_v57, %v514_v35  ;;  %v392_v9 = vrot.slane %v390_v60, 5 }
  0x39   : > { %v380_v8 = vrot.slane %v379_v61, 4  ;;  %v398_v10 = vrot.slane %v396_v0, 5  ;;  %v833_v11 = vrot.slane %v291_v34, 9  ;;  %v516_v3 = vmax.bf16 %v486_v49, %v441_v5  ;;  %v296_v49 = vld [vmem:[#allocation2 + $0x3c] sm:$0x1] }
  0x3a   : > { %v554_v12 = vrot.slane %v540_v1, %v936_v4  ;;  %v555_v13 = vcombine.high %v547_v2, %v547_v2  ;;  %v645_v14 = vunpack.c.l.bf16 %v547_v2  ;;  %v393_v17 = vor.u32 %v392_v9, %v389_v62 }
  0x3b   : > { %v385_v16 = vsel %vm961_vm10, %v380_v8, %v384_v59  ;;  %v489_v18 = vrot.slane %v292_v44, 5  ;;  %v834_v20 = vrot.slane %v990_v43, 9  ;;  %v526_v26 = vmax.bf16 %v522_v6, %v516_v3 }
  0x3c   : > { %v556_v21 = vcombine.high %v554_v12, %v554_v12  ;;  %v646_v7 = vunpack.c.l.bf16 %v554_v12  ;;  %v647_v22 = vunpack.c.l.bf16 %v555_v13  ;;  %v680_v23 = vrot.slane %v645_v14, %v932_v63 }
  0x3d   : > { %v394_v27 = vrot.slane %v393_v17, 4  ;;  %v442_v28 = vmax.bf16 %v385_v16, %v291_v34  ;;  %v490_v30 = vsel %vm968_vm11, %v833_v11, %v489_v18  ;;  %v493_v35 = vrot.slane %v294_v58, 5 }
  0x3e   : > { %v648_v31 = vunpack.c.l.bf16 %v556_v21  ;;  %v684_v32 = vrot.slane %v646_v7, %v932_v63  ;;  %v688_v33 = vrot.slane %v647_v22, %v932_v63  ;;  %v563_v36 = vrot.slane %v526_v26, %v936_v4 }
  0x3f   : > { %v399_v37 = vsel %vm961_vm10, %v394_v27, %v398_v10  ;;  %v517_v38 = vmax.bf16 %v490_v30, %v442_v28  ;;  %v401_v39 = vshrl.u32 %v1007_v25, 16  ;;  %v494_v42 = vsel %vm968_vm11, %v834_v20, %v493_v35  ;;  %v298_v10 = vld [vmem:[#allocation2 + $0x44] sm:$0x1] }
  0x40   : > { %v692_v34 = vrot.slane %v648_v31, %v932_v63  ;;  %v742_v24 = vsel %vm741_vm12, %v684_v32, %v680_v23  ;;  %v443_v41 = vmax.bf16 %v399_v37, %v990_v43  ;;  %v564_v15 = vcombine.high %v563_v36, %v563_v36 }
  0x41   : > { %v744_v29 = vsel %vm743_vm13, %v688_v33, %v742_v24  ;;  %v571_v44 = vrot.slane %v563_v36, %v936_v4  ;;  %v523_v19 = vmax.bf16 %v517_v38, %v516_v3  ;;  %v403_v50 = vrot.slane %v401_v39, 4 }
  0x42   : > { %v746_v46 = vsel %vm745_vm14, %v692_v34, %v744_v29  ;;  %v1033_v48 = vmax.bf16 %v494_v42, %v443_v41  ;;  %v404_v51 = vshll.u32 %v1007_v25, 16  ;;  %v578_v43 = vrot.slane %v564_v15, %v936_v4 }
  0x43   : > { %760 = vst [vmem:[%s1021_s16] sm:$0xf] %v746_v46  ;;  %v579_v52 = vcombine.high %v571_v44, %v571_v44  ;;  %v649_v53 = vunpack.c.l.bf16 %v571_v44  ;;  %v410_v54 = vshll.u32 %v296_v49, 16  ;;  %v415_v58 = vshrl.u32 %v1030_v45, 16 }
  0x44   : > { %v527_v55 = vmax.bf16 %v523_v19, %v1033_v48  ;;  %v406_v57 = vrot.slane %v404_v51, 5  ;;  %v418_v59 = vshll.u32 %v1030_v45, 16  ;;  %v580_v60 = vcombine.high %v578_v43, %v578_v43 }
  0x45   : > { %v650_v56 = vunpack.c.l.bf16 %v578_v43  ;;  %v651_v61 = vunpack.c.l.bf16 %v579_v52  ;;  %v696_v62 = vrot.slane %v649_v53, %v932_v63  ;;  %v412_v2 = vrot.slane %v410_v54, 5 }
  0x46   : > { %v587_v0 = vrot.slane %v527_v55, %v936_v4  ;;  %v407_v1 = vor.u32 %v406_v57, %v403_v50  ;;  %v417_v5 = vrot.slane %v415_v58, 4  ;;  %v652_v6 = vunpack.c.l.bf16 %v580_v60 }
  0x47   : > { %v700_v8 = vrot.slane %v650_v56, %v932_v63  ;;  %v704_v9 = vrot.slane %v651_v61, %v932_v63  ;;  %v420_v11 = vrot.slane %v418_v59, 5  ;;  %v424_v3 = vshll.u32 %v298_v10, 16 }
  0x48   : > { %v588_v12 = vcombine.high %v587_v0, %v587_v0  ;;  %v595_v13 = vrot.slane %v587_v0, %v936_v4  ;;  %v408_v14 = vrot.slane %v407_v1, 4  ;;  %v708_v16 = vrot.slane %v652_v6, %v932_v63 }
  0x49   : > { %v747_v17 = vsel %vm741_vm12, %v700_v8, %v696_v62  ;;  %v421_v18 = vor.u32 %v420_v11, %v417_v5  ;;  %v835_v20 = vrot.slane %v1007_v25, 9  ;;  %v426_v30 = vrot.slane %v424_v3, 5 }
  0x4a   : > { %v748_v21 = vsel %vm743_vm13, %v704_v9, %v747_v17  ;;  %v602_v7 = vrot.slane %v588_v12, %v936_v4  ;;  %v603_v22 = vcombine.high %v595_v13, %v595_v13  ;;  %v653_v23 = vunpack.c.l.bf16 %v595_v13 }
  0x4b   : > { %v749_v26 = vsel %vm745_vm14, %v708_v16, %v748_v21  ;;  %v413_v27 = vsel %vm961_vm10, %v408_v14, %v412_v2  ;;  %v422_v28 = vrot.slane %v421_v18, 4  ;;  %v497_v38 = vrot.slane %v296_v49, 5 }
  0x4c   : > { %761 = vst [vmem:[%s1021_s16 + $0x4] sm:$0xf] %v749_v26  ;;  %v604_v31 = vcombine.high %v602_v7, %v602_v7  ;;  %v654_v32 = vunpack.c.l.bf16 %v602_v7  ;;  %v655_v33 = vunpack.c.l.bf16 %v603_v22  ;;  %v712_v35 = vrot.slane %v653_v23, %v932_v63 }
  0x4d   : > { %v427_v36 = vsel %vm961_vm10, %v422_v28, %v426_v30  ;;  %v444_v37 = vmax.bf16 %v413_v27, %v1007_v25  ;;  %v836_v39 = vrot.slane %v1030_v45, 9  ;;  %v498_v29 = vsel %vm968_vm11, %v835_v20, %v497_v38 }
  0x4e   : > { %v656_v34 = vunpack.c.l.bf16 %v604_v31  ;;  %v716_v24 = vrot.slane %v654_v32, %v932_v63  ;;  %v720_v41 = vrot.slane %v655_v33, %v932_v63  ;;  %v445_v42 = vmax.bf16 %v427_v36, %v1030_v45 }
  0x4f   : > { %v501_v15 = vrot.slane %v298_v10, 5  ;;  %v519_v25 = vmax.bf16 %v498_v29, %v444_v37 }
  0x50   : > { %v724_v40 = vrot.slane %v656_v34, %v932_v63  ;;  %v750_v44 = vsel %vm741_vm12, %v716_v24, %v712_v35 }
  0x51   : > { %v751_v19 = vsel %vm743_vm13, %v720_v41, %v750_v44  ;;  %v502_v46 = vsel %vm968_vm11, %v836_v39, %v501_v15  ;;  %v524_v51 = vmax.bf16 %v519_v25, %v1033_v48 }
  0x52   : > { %v752_v49 = vsel %vm745_vm14, %v724_v40, %v751_v19  ;;  %v520_v50 = vmax.bf16 %v502_v46, %v445_v42 }
  0x53   : > { %762 = vst [vmem:[%s1021_s16 + $0x8] sm:$0xf] %v752_v49 }
  0x54   : > { %v528_v45 = vmax.bf16 %v524_v51, %v520_v50 }
  0x56   : > { %v611_v43 = vrot.slane %v528_v45, %v936_v4 }
  0x58   : > { %v612_v52 = vcombine.high %v611_v43, %v611_v43  ;;  %v619_v53 = vrot.slane %v611_v43, %v936_v4 }
  0x5a   : > { %v626_v54 = vrot.slane %v612_v52, %v936_v4  ;;  %v627_v55 = vcombine.high %v619_v53, %v619_v53  ;;  %v657_v57 = vunpack.c.l.bf16 %v619_v53 }
  0x5c   : > { %v628_v58 = vcombine.high %v626_v54, %v626_v54  ;;  %v658_v47 = vunpack.c.l.bf16 %v626_v54  ;;  %v659_v59 = vunpack.c.l.bf16 %v627_v55  ;;  %v728_v56 = vrot.slane %v657_v57, %v932_v63 }
  0x5e   : > { %v660_v60 = vunpack.c.l.bf16 %v628_v58  ;;  %v732_v48 = vrot.slane %v658_v47, %v932_v63  ;;  %v736_v61 = vrot.slane %v659_v59, %v932_v63 }
  0x60   : > { %v740_v62 = vrot.slane %v660_v60, %v932_v63  ;;  %v753_v0 = vsel %vm741_vm12, %v732_v48, %v728_v56 }
  0x61   : > { %v754_v1 = vsel %vm743_vm13, %v736_v61, %v753_v0 }
  0x62   : > { %v755_v4 = vsel %vm745_vm14, %v740_v62, %v754_v1 }
  0x63   : > { %763 = vst [vmem:[%s1021_s16 + $0xc] sm:$0xf] %v755_v4 }
  0x64 PF: > { %s11_s6 = sadd.s32 1, %s857_s6  }
  0x65   : > { %p8_p4 = scmp.ge.s32.totalorder %s11_s6, 4  }
  0x67   :  { %10 = sbr.rel (!%p8_p4) target bundleno = 1 (0x1), region = 55 }

</bundles_post_ra>
